<compile_context>
chip_gen: v5e
topology: v5e:2x2
jax: 0.10.0
libtpu: 0.0.40
codegen_flags: <defaults>
</compile_context>

<pallas_src>
import functools

import jax
import jax.numpy as jnp
from jax import lax
from jax.experimental import pallas as pl
from jax.experimental.pallas import tpu as pltpu

_LANES = 128
_ROW_ALIGN = 16  # 16 sublanes: clean packing even for bf16/fp16 inputs


def _round_up(x, m):
    return ((x + m - 1) // m) * m


def _smape_partial_kernel(s_ref, t_ref, part_ref, *, n_valid, block_rows, masked):
    """One row-tile: |s-t| / (|s|+|t|) reduced to an (8, 128) partial sum."""
    s = s_ref[...].astype(jnp.float32)
    t = t_ref[...].astype(jnp.float32)

    up = jnp.abs(s - t)
    down = jnp.abs(s) + jnp.abs(t)

    if masked:
        # Zero out padded / out-of-bounds tail elements of the last block.
        # Applied before the reciprocal so masked lanes never produce 0*inf.
        i = pl.program_id(0)
        row = lax.broadcasted_iota(jnp.int32, (block_rows, _LANES), 0)
        lane = lax.broadcasted_iota(jnp.int32, (block_rows, _LANES), 1)
        gidx = (i * block_rows + row) * _LANES + lane
        valid = gidx < n_valid
        up = jnp.where(valid, up, jnp.float32(0.0))
        down = jnp.where(valid, down, jnp.float32(1.0))

    # EUP reciprocal: separate issue slot, free next to the VPU/load slots once
    # the kernel is HBM-bound (~2^-12 rel. error, within the test tolerance).
    ratio = up * pl.reciprocal(down, approx=True)

    # Lane-aligned per-tile partial: leading-axis reshape of the (8,128)-tiled
    # layout is a free view, the sum over axis 0 is pure VPU adds (no XLU, no
    # carried accumulator, no SMEM scalar write).
    part_ref[...] = ratio.reshape(block_rows // 8, 8, _LANES).sum(axis=0)


@functools.partial(jax.jit, static_argnums=(2,), static_argnames=("max_block_rows",))
def smape(src, tgt, horizon, *, max_block_rows=4096):
    """Pallas equivalent of the PyTorch sMAPE module's forward().

    mean-over-horizon then mean-over-rows == global mean of the elementwise
    ratio (every row shares the same horizon), so the kernel streams a
    lane-dense [rows, 128] view of the flattened inputs, emits per-tile (8,128)
    partials, and finishes (sum * 200 / n) in plain JAX.
    """
    assert src.shape == tgt.shape
    n = int(src.size)
    assert n > 0 and n % horizon == 0, "total size must be divisible by horizon"
    assert max_block_rows % _ROW_ALIGN == 0

    rows_needed = -(-n // _LANES)
    block_rows = min(max_block_rows, _round_up(rows_needed, _ROW_ALIGN))
    rows = max(rows_needed, block_rows)      # block never exceeds the array
    pad = rows * _LANES - n                  # >0 only for tiny / sub-128 tails

    s = src.reshape(-1)
    t = tgt.reshape(-1)
    if pad:
        # TODO(synk): a sub-128-element tail still costs one small pad copy;
        # row-aligned inputs stream zero-copy from the caller's buffers.
        s = jnp.pad(s, (0, pad))
        t = jnp.pad(t, (0, pad))
    s = s.reshape(rows, _LANES)
    t = t.reshape(rows, _LANES)

    grid = -(-rows // block_rows)
    masked = (pad > 0) or (rows % block_rows != 0)

    # Keep compiler defaults unless the requested tiles need more scoped VMEM
    # (e.g. max_block_rows=16384 -> 8 MiB/input tiles for v7x's 3.2 TB/s HBM).
    block_bytes = block_rows * _LANES * src.dtype.itemsize
    vmem_need = 4 * block_bytes + (2 << 20)  # 2 inputs x 2 buffers + headroom
    compiler_kwargs = {}
    if vmem_need > (16 << 20):               # stay under v5e's default otherwise
        compiler_kwargs["vmem_limit_bytes"] = vmem_need

    partials = pl.pallas_call(
        functools.partial(
            _smape_partial_kernel,
            n_valid=n, block_rows=block_rows, masked=masked,
        ),
        out_shape=jax.ShapeDtypeStruct((grid * 8, _LANES), jnp.float32),
        grid_spec=pltpu.PrefetchScalarGridSpec(
            num_scalar_prefetch=0,
            grid=(grid,),
            in_specs=[
                pl.BlockSpec((block_rows, _LANES), lambda i: (i, 0)),
                pl.BlockSpec((block_rows, _LANES), lambda i: (i, 0)),
            ],
            out_specs=pl.BlockSpec((8, _LANES), lambda i: (i, 0)),
        ),
        compiler_params=pltpu.CompilerParams(
            # No carried state -> row-tile axis is embarrassingly parallel
            # (shards across both TensorCores on v7x; no effect on v5e/v6e).
            dimension_semantics=("parallel",),
            **compiler_kwargs,
        ),
    )(s, t)

    return jnp.sum(partials) * (jnp.float32(200.0) / jnp.float32(n))


def smape_ref(src, tgt, horizon):
    s = src.reshape(-1, horizon).astype(jnp.float32)
    t = tgt.reshape(-1, horizon).astype(jnp.float32)
    up = jnp.abs(s - t)
    down = jnp.abs(s) + jnp.abs(t)
    return jnp.mean(jnp.mean(up / down, axis=-1) * 200.0)


if __name__ == "__main__":
    horizon = 8
    keys = jax.random.split(jax.random.PRNGKey(0), 8)

    def check(src, tgt, **kw):
        out = jax.block_until_ready(smape(src, tgt, horizon, **kw))
        ref = smape_ref(src, tgt, horizon)
        assert jnp.allclose(out, ref, rtol=1e-3, atol=1e-3), (out, ref)

    # Tiny module-consistent shape (batch=2, channels=4, seq=horizon):
    # sub-128 tail -> single padded block with in-kernel masking.
    check(jax.random.normal(keys[0], (2, 4, horizon), jnp.float32) + 2.0,
          jax.random.normal(keys[1], (2, 4, horizon), jnp.float32) + 2.0)

    # Row-aligned zero-copy path (n = 2048 -> one 16x128 block, no mask).
    check(jax.random.normal(keys[2], (4, 64, horizon), jnp.float32) + 2.0,
          jax.random.normal(keys[3], (4, 64, horizon), jnp.float32) + 2.0)

    # Zero-copy ragged multi-block path: 18 rows of 128 with block_rows=16 ->
    # grid=2, last block partially out-of-bounds and masked in-kernel.
    check(jax.random.normal(keys[4], (9, 32, horizon), jnp.float32) + 2.0,
          jax.random.normal(keys[5], (9, 32, horizon), jnp.float32) + 2.0,
          max_block_rows=16)

    # Native bf16 streaming (halved HBM bytes; cast to f32 inside the kernel).
    check((jax.random.normal(keys[6], (8, 32, horizon), jnp.float32) + 2.0).astype(jnp.bfloat16),
          (jax.random.normal(keys[7], (8, 32, horizon), jnp.float32) + 2.0).astype(jnp.bfloat16))

    print("KERNEL_OK")
</pallas_src>

<mosaic_0001>
module attributes {stable_mosaic.version = 11 : i64} {
  func.func @_smape_partial_kernel(%arg0: i32, %arg1: memref<16x128xf32, #tpu.memory_space<vmem>>, %arg2: memref<16x128xf32, #tpu.memory_space<vmem>>, %arg3: memref<8x128xf32, #tpu.memory_space<vmem>>) attributes {dimension_semantics = [#tpu.dimension_semantics<parallel>], iteration_bounds = array<i64: 1>, scalar_prefetch = 0 : i64, scratch_operands = 0 : i64, tpu.core_type = #tpu.core_type<tc>, window_params = [{transform_indices = @transform_0, window_bounds = array<i64: 16, 128>}, {transform_indices = @transform_1, window_bounds = array<i64: 16, 128>}, {transform_indices = @transform_2, window_bounds = array<i64: 8, 128>}]} {
    %c0 = arith.constant 0 : index
    %c0_0 = arith.constant 0 : index
    %0 = vector.load %arg1[%c0, %c0_0] : memref<16x128xf32, #tpu.memory_space<vmem>>, vector<16x128xf32>
    %c0_1 = arith.constant 0 : index
    %c0_2 = arith.constant 0 : index
    %1 = vector.load %arg2[%c0_1, %c0_2] : memref<16x128xf32, #tpu.memory_space<vmem>>, vector<16x128xf32>
    %2 = arith.subf %0, %1 : vector<16x128xf32>
    %3 = math.absf %2 : vector<16x128xf32>
    %4 = math.absf %0 : vector<16x128xf32>
    %5 = math.absf %1 : vector<16x128xf32>
    %6 = arith.addf %4, %5 : vector<16x128xf32>
    %7 = tpu.iota {dimensions = array<i32: 0>} : vector<16x128xi32>
    %8 = tpu.iota {dimensions = array<i32: 1>} : vector<16x128xi32>
    %c16_i32 = arith.constant 16 : i32
    %9 = arith.muli %arg0, %c16_i32 : i32
    %10 = vector.broadcast %9 : i32 to vector<16x128xi32>
    %11 = arith.addi %10, %7 : vector<16x128xi32>
    %c128_i32 = arith.constant 128 : i32
    %12 = vector.broadcast %c128_i32 : i32 to vector<16x128xi32>
    %13 = arith.muli %11, %12 : vector<16x128xi32>
    %14 = arith.addi %13, %8 : vector<16x128xi32>
    %c64_i32 = arith.constant 64 : i32
    %15 = vector.broadcast %c64_i32 : i32 to vector<16x128xi32>
    %16 = arith.cmpi slt, %14, %15 : vector<16x128xi32>
    %cst = arith.constant 0.000000e+00 : f32
    %17 = vector.broadcast %cst : f32 to vector<16x128xf32>
    %18 = arith.select %16, %3, %17 : vector<16x128xi1>, vector<16x128xf32>
    %cst_3 = arith.constant 1.000000e+00 : f32
    %19 = vector.broadcast %cst_3 : f32 to vector<16x128xf32>
    %20 = arith.select %16, %6, %19 : vector<16x128xi1>, vector<16x128xf32>
    %21 = tpu.reciprocal %20 {approx = true} : vector<16x128xf32> -> vector<16x128xf32>
    %22 = arith.mulf %18, %21 : vector<16x128xf32>
    %23 = vector.shape_cast %22 : vector<16x128xf32> to vector<2x8x128xf32>
    %cst_4 = arith.constant dense<0.000000e+00> : vector<8x128xf32>
    %24 = vector.multi_reduction <add>, %23, %cst_4 [0] : vector<2x8x128xf32> to vector<8x128xf32>
    %c0_5 = arith.constant 0 : index
    %c0_6 = arith.constant 0 : index
    %25 = vector.load %arg3[%c0_5, %c0_6] : memref<8x128xf32, #tpu.memory_space<vmem>>, vector<8x128xf32>
    tpu.vector_store %arg3[%c0_5, %c0_6], %24 {strides = array<i32>} : memref<8x128xf32, #tpu.memory_space<vmem>>, vector<8x128xf32>,
    return
  }
  func.func @transform_0(%arg0: i32) -> (i32, i32) {
    %c0_i32 = arith.constant 0 : i32
    %c0_i32_0 = arith.constant 0 : i32
    return %arg0, %c0_i32 : i32, i32
  }
  func.func @transform_1(%arg0: i32) -> (i32, i32) {
    %c0_i32 = arith.constant 0 : i32
    %c0_i32_0 = arith.constant 0 : i32
    return %arg0, %c0_i32 : i32, i32
  }
  func.func @transform_2(%arg0: i32) -> (i32, i32) {
    %c0_i32 = arith.constant 0 : i32
    %c0_i32_0 = arith.constant 0 : i32
    return %arg0, %c0_i32 : i32, i32
  }
}

</mosaic_0001>

<bundles_post_ra>
// kernel: smape.1
= control target key start
LH: loop header
LB: loop body
LE: loop exit
PB: predicated region body
PF: predicated region fallthrough
CT: control target
= control target key end

     0   :  { %v25_v0 = vlaneseq  ;;  %s88_s0 = inlined_call_operand.vmem [shape: f32[16,128], index: 0, kind: input, shape index: {}]   ;;  %s89_s1 = inlined_call_operand.vmem [shape: f32[16,128], index: 1, kind: input, shape index: {}]   ;;  %s90_s2 = inlined_call_operand.vmem [shape: f32[8,128], index: 2, kind: output, shape index: {}]  }
   0x1   :  { %v11_v1 = vld [vmem:[%s88_s0] sm:$0xff]  ;;  %v12_v2 = vld [vmem:[%s88_s0 + $0x8] sm:$0xff] }
   0x2   :  { %v13_v3 = vld [vmem:[%s89_s1] sm:$0xff]  ;;  %v14_v4 = vld [vmem:[%s89_s1 + $0x8] sm:$0xff]  ;;  %v19_v5 = vand.u32 2147483647, %v11_v1  ;;  %v20_v6 = vand.u32 2147483647, %v12_v2 }
   0x3   :  { %v26_v7 = vshrl.u32 %v25_v0, 7  ;;  %v21_v8 = vand.u32 2147483647, %v13_v3  ;;  %v22_v9 = vand.u32 2147483647, %v14_v4  ;;  %v29_v10 = vand.u32 127, %v25_v0 }
   0x4   :  { %v15_v14 = vsub.f32 %v11_v1, %v13_v3  ;;  %v16_v18 = vsub.f32 %v12_v2, %v14_v4 }
   0x5   :  { %v27_v11 = vadd.s32 8, %v26_v7  ;;  %v34_v12 = vmul.u32 128, %v26_v7  ;;  %v23_v13 = vadd.f32 %v21_v8, %v19_v5  ;;  %v24_v17 = vadd.f32 %v22_v9, %v20_v6 }
   0x6   :  { %v17_v21 = vand.u32 2147483647, %v15_v14  ;;  %v18_v23 = vand.u32 2147483647, %v16_v18 }
   0x7   :  { %v35_v15 = vmul.u32 128, %v27_v11  ;;  %v36_v16 = vadd.s32 %v34_v12, %v29_v10 }
   0x9   :  { %v37_v19 = vadd.s32 %v35_v15, %v29_v10  ;;  %vm38_vm0 = vcmp.lt.s32.totalorder %v36_v16, 64 }
   0xa   :  { %v42_v20 = vsel %vm38_vm0, %v23_v13, 1.0  ;;  %v40_v24 = vsel %vm38_vm0, %v17_v21, 0.0 }
   0xb   :  { %vm39_vm1 = vcmp.lt.s32.totalorder %v37_v19, 64  ;;  %54 = vrcp.f32 %v42_v20 }
   0xc   :  { %v43_v22 = vsel %vm39_vm1, %v24_v17, 1.0  ;;  %v41_v26 = vsel %vm39_vm1, %v18_v23, 0.0 }
   0xd   :  { %56 = vrcp.f32 %v43_v22 }
  0x11   :  { %v55_v25 = vpop.eup %54 }
  0x12   :  { %v46_v27 = vmul.f32 %v55_v25, %v40_v24 }
  0x13   :  { %v57_v28 = vpop.eup %56 }
  0x14   :  { %v47_v29 = vmul.f32 %v57_v28, %v41_v26 }
  0x16   :  { %v48_v30 = vadd.f32 %v47_v29, %v46_v27 }
  0x18   :  { %49 = vst [vmem:[%s90_s2] sm:$0xff] %v48_v30 }

</bundles_post_ra>
